<compile_context>
chip_gen: v6e
topology: v6e:2x2x1
jax: 0.10.0
libtpu: 0.0.40
codegen_flags: <defaults>
</compile_context>

<pallas_src>
import functools

import jax
import jax.numpy as jnp
from jax.experimental import pallas as pl
from jax.experimental.pallas import tpu as pltpu


def simsiam_kernel(x_ref, wc_ref, bc_ref, we_ref, be_ref,
                   wa_ref, ba_ref, wp_ref, bp_ref,
                   p_ref, z_ref, sum_ref, *, inv_hw):
    k = pl.program_id(1)

    # --- init per-batch-row pixel-sum accumulator at first pixel block ---
    @pl.when(k == 0)
    def _():
        sum_ref[...] = jnp.zeros_like(sum_ref)

    # --- accumulate row sums of this (block_b, block_hw) tile (XLU reduce) ---
    sum_ref[...] += jnp.sum(x_ref[...], axis=-1, keepdims=True)

    # --- finalize: tiny per-batch head, computed once per batch block ---
    @pl.when(k == pl.num_programs(1) - 1)
    def _():
        mean_x = sum_ref[...] * inv_hw                            # (bB, 1)
        # channel_projection commuted with GAP (both linear/affine, exact):
        gap = mean_x * wc_ref[...] + bc_ref[...]                  # (bB, 3)
        # encoder stand-in: Linear(3 -> dim) + ReLU
        feat = jnp.dot(gap, we_ref[...],
                       preferred_element_type=jnp.float32) + be_ref[...]
        feat = jnp.maximum(feat, 0.0)                             # (bB, dim)
        # adapter: Linear(dim -> pd)  (pd zero-padded to lane-dense width)
        z = jnp.dot(feat, wa_ref[...],
                    preferred_element_type=jnp.float32) + ba_ref[...]
        # predictor: Linear(pd -> pd)
        p = jnp.dot(z, wp_ref[...],
                    preferred_element_type=jnp.float32) + bp_ref[...]
        p_ref[...] = p.astype(p_ref.dtype)
        z_ref[...] = z.astype(z_ref.dtype)


def _round_up(x, m):
    return ((x + m - 1) // m) * m


def init_params(key, dim=32, prediction_dim=16):
    """Weights stored transposed (in @ W^T layout) and zero-padded lane-dense."""
    pd_pad = max(128, _round_up(prediction_dim, 128))
    ks = jax.random.split(key, 8)
    s = 0.1
    f32 = jnp.float32
    # Conv2d(1, 3, 1): weight (3,1,1,1) stored as (1,3); bias as (1,3).
    wc = jax.random.normal(ks[0], (1, 3), f32) * s
    bc = jax.random.normal(ks[1], (1, 3), f32) * s
    # encoder stand-in fc: Linear(3, dim) -> W^T (3, dim); bias (1, dim).
    we_t = jax.random.normal(ks[2], (3, dim), f32) * s
    be = jax.random.normal(ks[3], (1, dim), f32) * s
    # adapter: Linear(dim, pd) -> W^T (dim, pd); bias (1, pd).
    wa_t = jax.random.normal(ks[4], (dim, prediction_dim), f32) * s
    ba = jax.random.normal(ks[5], (1, prediction_dim), f32) * s
    # predictor: Linear(pd, pd) -> W^T (pd, pd); bias (1, pd).
    wp_t = jax.random.normal(ks[6], (prediction_dim, prediction_dim), f32) * s
    bp = jax.random.normal(ks[7], (1, prediction_dim), f32) * s

    # Zero-pad pd to pd_pad so in-kernel outputs are lane-dense; exact because
    # the padded z columns are 0 and the padded wp rows/cols are 0.
    wa_t_pad = jnp.zeros((dim, pd_pad), f32).at[:, :prediction_dim].set(wa_t)
    ba_pad = jnp.zeros((1, pd_pad), f32).at[:, :prediction_dim].set(ba)
    wp_t_pad = jnp.zeros((pd_pad, pd_pad), f32).at[
        :prediction_dim, :prediction_dim].set(wp_t)
    bp_pad = jnp.zeros((1, pd_pad), f32).at[:, :prediction_dim].set(bp)

    return dict(wc=wc, bc=bc, we_t=we_t, be=be,
                wa_t_pad=wa_t_pad, ba_pad=ba_pad,
                wp_t_pad=wp_t_pad, bp_pad=bp_pad,
                pd=prediction_dim)


def simsiam_forward(x, params, *, block_b=None, block_hw=None):
    """x: (B, 1, H, W) float32 (NCHW like the PyTorch module). Returns (p, z)."""
    B, Cin, H, W = x.shape
    assert Cin == 1
    HW = H * W
    x2d = x.reshape(B, HW)            # lane-dense input layout

    dim = params["we_t"].shape[1]
    pd_pad = params["wp_t_pad"].shape[0]
    pd = params["pd"]

    # --- tiling: batch axis (parallel), pixel reduction axis (arbitrary, last) ---
    if block_hw is None:
        block_hw = 512 if HW % 512 == 0 else (128 if HW % 128 == 0 else HW)
    assert HW % block_hw == 0
    if block_b is None:
        block_b = min(B, 8) if B % 8 == 0 else B
    assert B % block_b == 0
    grid = (B // block_b, HW // block_hw)

    kernel = functools.partial(simsiam_kernel, inv_hw=1.0 / HW)
    const = lambda b, k: (0, 0)       # weights stay VMEM-resident across grid

    p_pad, z_pad = pl.pallas_call(
        kernel,
        out_shape=(jax.ShapeDtypeStruct((B, pd_pad), jnp.float32),
                   jax.ShapeDtypeStruct((B, pd_pad), jnp.float32)),
        grid_spec=pltpu.PrefetchScalarGridSpec(
            num_scalar_prefetch=0,
            grid=grid,
            in_specs=[
                pl.BlockSpec((block_b, block_hw), lambda b, k: (b, k)),  # x
                pl.BlockSpec((1, 3), const),            # wc
                pl.BlockSpec((1, 3), const),            # bc
                pl.BlockSpec((3, dim), const),          # we_t
                pl.BlockSpec((1, dim), const),          # be
                pl.BlockSpec((dim, pd_pad), const),     # wa_t_pad
                pl.BlockSpec((1, pd_pad), const),       # ba_pad
                pl.BlockSpec((pd_pad, pd_pad), const),  # wp_t_pad
                pl.BlockSpec((1, pd_pad), const),       # bp_pad
            ],
            out_specs=(
                pl.BlockSpec((block_b, pd_pad), lambda b, k: (b, 0)),    # p
                pl.BlockSpec((block_b, pd_pad), lambda b, k: (b, 0)),    # z
            ),
            scratch_shapes=[pltpu.VMEM((block_b, 1), jnp.float32)],
        ),
        compiler_params=pltpu.CompilerParams(
            dimension_semantics=("parallel", "arbitrary"),
            vmem_limit_bytes=32 * 1024 * 1024,
        ),
    )(x2d, params["wc"], params["bc"], params["we_t"], params["be"],
      params["wa_t_pad"], params["ba_pad"], params["wp_t_pad"], params["bp_pad"])

    p = p_pad[:, :pd]
    z = z_pad[:, :pd]
    # PyTorch forward returns (p, z.detach())
    return p, jax.lax.stop_gradient(z)


def _reference(x, params):
    """Pure-JAX reference of the same stand-in forward pass."""
    B, _, H, W = x.shape
    pd = params["pd"]
    mean_x = x.reshape(B, H * W).mean(axis=-1, keepdims=True)
    gap = mean_x * params["wc"] + params["bc"]
    feat = jnp.maximum(gap @ params["we_t"] + params["be"], 0.0)
    z = feat @ params["wa_t_pad"][:, :pd] + params["ba_pad"][:, :pd]
    p = z @ params["wp_t_pad"][:pd, :pd] + params["bp_pad"][:, :pd]
    return p, z


if __name__ == "__main__":
    key = jax.random.PRNGKey(0)
    kx, kp = jax.random.split(key)

    # small shapes: batch=2, single input channel, 16x16 spatial,
    # dim=32 (instead of 2048), prediction_dim=16 (instead of 1024)
    x = jax.random.normal(kx, (2, 1, 16, 16), jnp.float32)
    params = init_params(kp, dim=32, prediction_dim=16)

    p, z = simsiam_forward(x, params)
    jax.block_until_ready((p, z))

    assert p.shape == (2, 16) and z.shape == (2, 16)

    p_ref, z_ref = _reference(x, params)
    assert jnp.allclose(p, p_ref, atol=1e-4, rtol=1e-4)
    assert jnp.allclose(z, z_ref, atol=1e-4, rtol=1e-4)

    print("KERNEL_OK")
</pallas_src>

<mosaic_0001>
module attributes {stable_mosaic.version = 11 : i64} {
  func.func @simsiam_kernel(%arg0: i32, %arg1: i32, %arg2: memref<2x128xf32, #tpu.memory_space<vmem>>, %arg3: memref<1x3xf32, #tpu.memory_space<vmem>>, %arg4: memref<1x3xf32, #tpu.memory_space<vmem>>, %arg5: memref<3x32xf32, #tpu.memory_space<vmem>>, %arg6: memref<1x32xf32, #tpu.memory_space<vmem>>, %arg7: memref<32x128xf32, #tpu.memory_space<vmem>>, %arg8: memref<1x128xf32, #tpu.memory_space<vmem>>, %arg9: memref<128x128xf32, #tpu.memory_space<vmem>>, %arg10: memref<1x128xf32, #tpu.memory_space<vmem>>, %arg11: memref<2x128xf32, #tpu.memory_space<vmem>>, %arg12: memref<2x128xf32, #tpu.memory_space<vmem>>, %arg13: memref<2x1xf32, #tpu.memory_space<vmem>>) attributes {dimension_semantics = [#tpu.dimension_semantics<parallel>, #tpu.dimension_semantics<arbitrary>], iteration_bounds = array<i64: 1, 2>, scalar_prefetch = 0 : i64, scratch_operands = 1 : i64, tpu.core_type = #tpu.core_type<tc>, window_params = [{transform_indices = @transform_0, window_bounds = array<i64: 2, 128>}, {pipeline_mode = #tpu.pipeline_mode<synchronous>, transform_indices = @transform_1, window_bounds = array<i64: 1, 3>}, {pipeline_mode = #tpu.pipeline_mode<synchronous>, transform_indices = @transform_2, window_bounds = array<i64: 1, 3>}, {pipeline_mode = #tpu.pipeline_mode<synchronous>, transform_indices = @transform_3, window_bounds = array<i64: 3, 32>}, {pipeline_mode = #tpu.pipeline_mode<synchronous>, transform_indices = @transform_4, window_bounds = array<i64: 1, 32>}, {pipeline_mode = #tpu.pipeline_mode<synchronous>, transform_indices = @transform_5, window_bounds = array<i64: 32, 128>}, {pipeline_mode = #tpu.pipeline_mode<synchronous>, transform_indices = @transform_6, window_bounds = array<i64: 1, 128>}, {pipeline_mode = #tpu.pipeline_mode<synchronous>, transform_indices = @transform_7, window_bounds = array<i64: 128, 128>}, {pipeline_mode = #tpu.pipeline_mode<synchronous>, transform_indices = @transform_8, window_bounds = array<i64: 1, 128>}, {transform_indices = @transform_9, window_bounds = array<i64: 2, 128>}, {transform_indices = @transform_10, window_bounds = array<i64: 2, 128>}]} {
    %c0_i32 = arith.constant 0 : i32
    %0 = arith.cmpi eq, %arg1, %c0_i32 : i32
    %1 = arith.extui %0 : i1 to i32
    %c0_i32_0 = arith.constant 0 : i32
    %2 = arith.cmpi ne, %1, %c0_i32_0 : i32
    scf.if %2 {
      %cst_7 = arith.constant 0.000000e+00 : f32
      %12 = vector.broadcast %cst_7 : f32 to vector<2x1xf32>
      %c0_8 = arith.constant 0 : index
      %c0_9 = arith.constant 0 : index
      %13 = vector.load %arg13[%c0_8, %c0_9] : memref<2x1xf32, #tpu.memory_space<vmem>>, vector<2x1xf32>
      tpu.vector_store %arg13[%c0_8, %c0_9], %12 {strides = array<i32>} : memref<2x1xf32, #tpu.memory_space<vmem>>, vector<2x1xf32>,
    } else {
    }
    %c0 = arith.constant 0 : index
    %c0_1 = arith.constant 0 : index
    %3 = vector.load %arg13[%c0, %c0_1] : memref<2x1xf32, #tpu.memory_space<vmem>>, vector<2x1xf32>
    %c0_2 = arith.constant 0 : index
    %c0_3 = arith.constant 0 : index
    %4 = vector.load %arg2[%c0_2, %c0_3] : memref<2x128xf32, #tpu.memory_space<vmem>>, vector<2x128xf32>
    %cst = arith.constant dense<0.000000e+00> : vector<2xf32>
    %5 = vector.multi_reduction <add>, %4, %cst [1] : vector<2x128xf32> to vector<2xf32>
    %6 = vector.shape_cast %5 : vector<2xf32> to vector<2x1xf32>
    %7 = arith.addf %3, %6 : vector<2x1xf32>
    %c0_4 = arith.constant 0 : index
    %c0_5 = arith.constant 0 : index
    %8 = vector.load %arg13[%c0_4, %c0_5] : memref<2x1xf32, #tpu.memory_space<vmem>>, vector<2x1xf32>
    tpu.vector_store %arg13[%c0_4, %c0_5], %7 {strides = array<i32>} : memref<2x1xf32, #tpu.memory_space<vmem>>, vector<2x1xf32>,
    %c1_i32 = arith.constant 1 : i32
    %9 = arith.cmpi eq, %arg1, %c1_i32 : i32
    %10 = arith.extui %9 : i1 to i32
    %c0_i32_6 = arith.constant 0 : i32
    %11 = arith.cmpi ne, %10, %c0_i32_6 : i32
    scf.if %11 {
      %c0_7 = arith.constant 0 : index
      %c0_8 = arith.constant 0 : index
      %12 = vector.load %arg13[%c0_7, %c0_8] : memref<2x1xf32, #tpu.memory_space<vmem>>, vector<2x1xf32>
      %cst_9 = arith.constant 3.906250e-03 : f32
      %13 = vector.broadcast %cst_9 : f32 to vector<2x1xf32>
      %14 = arith.mulf %12, %13 : vector<2x1xf32>
      %c0_10 = arith.constant 0 : index
      %c0_11 = arith.constant 0 : index
      %15 = vector.load %arg3[%c0_10, %c0_11] : memref<1x3xf32, #tpu.memory_space<vmem>>, vector<1x3xf32>
      %16 = vector.broadcast %14 : vector<2x1xf32> to vector<2x3xf32>
      %17 = vector.broadcast %15 : vector<1x3xf32> to vector<2x3xf32>
      %18 = arith.mulf %16, %17 : vector<2x3xf32>
      %c0_12 = arith.constant 0 : index
      %c0_13 = arith.constant 0 : index
      %19 = vector.load %arg4[%c0_12, %c0_13] : memref<1x3xf32, #tpu.memory_space<vmem>>, vector<1x3xf32>
      %20 = vector.broadcast %19 : vector<1x3xf32> to vector<2x3xf32>
      %21 = arith.addf %18, %20 : vector<2x3xf32>
      %c0_14 = arith.constant 0 : index
      %c0_15 = arith.constant 0 : index
      %22 = vector.load %arg5[%c0_14, %c0_15] : memref<3x32xf32, #tpu.memory_space<vmem>>, vector<3x32xf32>
      %cst_16 = arith.constant dense<0.000000e+00> : vector<2x32xf32>
      %23 = tpu.matmul %21, %22, %cst_16 {dimension_numbers = #tpu.dot_dimension_numbers<[1], [0], [0], [1], [0, 0, 1, 1], [], []>} : vector<2x3xf32>, vector<3x32xf32>, vector<2x32xf32> -> vector<2x32xf32>
      %c0_17 = arith.constant 0 : index
      %c0_18 = arith.constant 0 : index
      %24 = vector.load %arg6[%c0_17, %c0_18] : memref<1x32xf32, #tpu.memory_space<vmem>>, vector<1x32xf32>
      %25 = vector.broadcast %24 : vector<1x32xf32> to vector<2x32xf32>
      %26 = arith.addf %23, %25 : vector<2x32xf32>
      %cst_19 = arith.constant 0.000000e+00 : f32
      %27 = vector.broadcast %cst_19 : f32 to vector<2x32xf32>
      %28 = arith.maximumf %26, %27 : vector<2x32xf32>
      %c0_20 = arith.constant 0 : index
      %c0_21 = arith.constant 0 : index
      %29 = vector.load %arg7[%c0_20, %c0_21] : memref<32x128xf32, #tpu.memory_space<vmem>>, vector<32x128xf32>
      %cst_22 = arith.constant dense<0.000000e+00> : vector<2x128xf32>
      %30 = tpu.matmul %28, %29, %cst_22 {dimension_numbers = #tpu.dot_dimension_numbers<[1], [0], [0], [1], [0, 0, 1, 1], [], []>} : vector<2x32xf32>, vector<32x128xf32>, vector<2x128xf32> -> vector<2x128xf32>
      %c0_23 = arith.constant 0 : index
      %c0_24 = arith.constant 0 : index
      %31 = vector.load %arg8[%c0_23, %c0_24] : memref<1x128xf32, #tpu.memory_space<vmem>>, vector<1x128xf32>
      %32 = vector.broadcast %31 : vector<1x128xf32> to vector<2x128xf32>
      %33 = arith.addf %30, %32 : vector<2x128xf32>
      %c0_25 = arith.constant 0 : index
      %c0_26 = arith.constant 0 : index
      %34 = vector.load %arg9[%c0_25, %c0_26] : memref<128x128xf32, #tpu.memory_space<vmem>>, vector<128x128xf32>
      %cst_27 = arith.constant dense<0.000000e+00> : vector<2x128xf32>
      %35 = tpu.matmul %33, %34, %cst_27 {dimension_numbers = #tpu.dot_dimension_numbers<[1], [0], [0], [1], [0, 0, 1, 1], [], []>} : vector<2x128xf32>, vector<128x128xf32>, vector<2x128xf32> -> vector<2x128xf32>
      %c0_28 = arith.constant 0 : index
      %c0_29 = arith.constant 0 : index
      %36 = vector.load %arg10[%c0_28, %c0_29] : memref<1x128xf32, #tpu.memory_space<vmem>>, vector<1x128xf32>
      %37 = vector.broadcast %36 : vector<1x128xf32> to vector<2x128xf32>
      %38 = arith.addf %35, %37 : vector<2x128xf32>
      %c0_30 = arith.constant 0 : index
      %c0_31 = arith.constant 0 : index
      %39 = vector.load %arg11[%c0_30, %c0_31] : memref<2x128xf32, #tpu.memory_space<vmem>>, vector<2x128xf32>
      tpu.vector_store %arg11[%c0_30, %c0_31], %38 {strides = array<i32>} : memref<2x128xf32, #tpu.memory_space<vmem>>, vector<2x128xf32>,
      %c0_32 = arith.constant 0 : index
      %c0_33 = arith.constant 0 : index
      %40 = vector.load %arg12[%c0_32, %c0_33] : memref<2x128xf32, #tpu.memory_space<vmem>>, vector<2x128xf32>
      tpu.vector_store %arg12[%c0_32, %c0_33], %33 {strides = array<i32>} : memref<2x128xf32, #tpu.memory_space<vmem>>, vector<2x128xf32>,
    } else {
    }
    return
  }
  func.func @transform_0(%arg0: i32, %arg1: i32) -> (i32, i32) {
    %c0_i32 = arith.constant 0 : i32
    return %arg0, %arg1 : i32, i32
  }
  func.func @transform_1(%arg0: i32, %arg1: i32) -> (i32, i32) {
    %c0_i32 = arith.constant 0 : i32
    %c0_i32_0 = arith.constant 0 : i32
    %c0_i32_1 = arith.constant 0 : i32
    return %c0_i32, %c0_i32_0 : i32, i32
  }
  func.func @transform_2(%arg0: i32, %arg1: i32) -> (i32, i32) {
    %c0_i32 = arith.constant 0 : i32
    %c0_i32_0 = arith.constant 0 : i32
    %c0_i32_1 = arith.constant 0 : i32
    return %c0_i32, %c0_i32_0 : i32, i32
  }
  func.func @transform_3(%arg0: i32, %arg1: i32) -> (i32, i32) {
    %c0_i32 = arith.constant 0 : i32
    %c0_i32_0 = arith.constant 0 : i32
    %c0_i32_1 = arith.constant 0 : i32
    return %c0_i32, %c0_i32_0 : i32, i32
  }
  func.func @transform_4(%arg0: i32, %arg1: i32) -> (i32, i32) {
    %c0_i32 = arith.constant 0 : i32
    %c0_i32_0 = arith.constant 0 : i32
    %c0_i32_1 = arith.constant 0 : i32
    return %c0_i32, %c0_i32_0 : i32, i32
  }
  func.func @transform_5(%arg0: i32, %arg1: i32) -> (i32, i32) {
    %c0_i32 = arith.constant 0 : i32
    %c0_i32_0 = arith.constant 0 : i32
    %c0_i32_1 = arith.constant 0 : i32
    return %c0_i32, %c0_i32_0 : i32, i32
  }
  func.func @transform_6(%arg0: i32, %arg1: i32) -> (i32, i32) {
    %c0_i32 = arith.constant 0 : i32
    %c0_i32_0 = arith.constant 0 : i32
    %c0_i32_1 = arith.constant 0 : i32
    return %c0_i32, %c0_i32_0 : i32, i32
  }
  func.func @transform_7(%arg0: i32, %arg1: i32) -> (i32, i32) {
    %c0_i32 = arith.constant 0 : i32
    %c0_i32_0 = arith.constant 0 : i32
    %c0_i32_1 = arith.constant 0 : i32
    return %c0_i32, %c0_i32_0 : i32, i32
  }
  func.func @transform_8(%arg0: i32, %arg1: i32) -> (i32, i32) {
    %c0_i32 = arith.constant 0 : i32
    %c0_i32_0 = arith.constant 0 : i32
    %c0_i32_1 = arith.constant 0 : i32
    return %c0_i32, %c0_i32_0 : i32, i32
  }
  func.func @transform_9(%arg0: i32, %arg1: i32) -> (i32, i32) {
    %c0_i32 = arith.constant 0 : i32
    %c0_i32_0 = arith.constant 0 : i32
    return %arg0, %c0_i32 : i32, i32
  }
  func.func @transform_10(%arg0: i32, %arg1: i32) -> (i32, i32) {
    %c0_i32 = arith.constant 0 : i32
    %c0_i32_0 = arith.constant 0 : i32
    return %arg0, %c0_i32 : i32, i32
  }
}

</mosaic_0001>

<bundles_post_ra>
// kernel: tpu_custom_call.1
= control target key start
LH: loop header
LB: loop body
LE: loop exit
PB: predicated region body
PF: predicated region fallthrough
CT: control target
= control target key end

     0   :  { %s1583_s0 = inlined_call_operand.hbm [shape: f32[2,256], index: 0, kind: input, shape index: {}]   ;;  %s1584_s1 = inlined_call_operand.vmem [shape: f32[1,3], index: 1, kind: input, shape index: {}]   ;;  %s1585_s2 = inlined_call_operand.hbm [shape: f32[1,3], index: 2, kind: input, shape index: {}]   ;;  %s1586_s3 = inlined_call_operand.vmem [shape: f32[3,32], index: 3, kind: input, shape index: {}]   ;;  %s1587_s4 = inlined_call_operand.vmem [shape: f32[1,32], index: 4, kind: input, shape index: {}]   ;;  %s1588_s5 = inlined_call_operand.hbm [shape: f32[32,128], index: 5, kind: input, shape index: {}]   ;;  %s1589_s6 = inlined_call_operand.vmem [shape: f32[1,128], index: 6, kind: input, shape index: {}]   ;;  %s1590_s7 = inlined_call_operand.hbm [shape: f32[128,128], index: 7, kind: input, shape index: {}]   ;;  %s1591_s8 = inlined_call_operand.vmem [shape: f32[1,128], index: 8, kind: input, shape index: {}]   ;;  %s1592_s9 = inlined_call_operand.hbm [shape: f32[2,128], index: 9, kind: output, shape index: {0}]   ;;  %s1593_s10 = inlined_call_operand.hbm [shape: f32[2,128], index: 10, kind: output, shape index: {1}]  }
   0x1   :  { %1595 = sst [smem:[#allocation19_spill]] %s1585_s2 }
   0x2   :  { %1596 = sst [smem:[#allocation20_spill]] %s1588_s5 }
   0x3   :  { %1597 = sst [smem:[#allocation21_spill]] %s1590_s7 }
   0x4   :  { %16 = vsyncpa [#allocation4], 0 }
   0x5   :  { %18 = vsyncpa [#allocation4 + $0x1], 0 }
   0x6   :  { %19 = vsyncpa [#allocation7], 0 }
   0x7   :  { %20 = vsyncpa [#allocation10], 0 }
   0x8   :  { %21 = vsyncpa [#allocation5], 0 }
   0x9   :  { %22 = vsyncpa [#allocation13], 0  ;;  %s1366_s13 = smov 0   ;;  %s1368_s14 = smov 0  }
   0xa   :  { %s1370_s15 = smov 0   ;;  %s1372_s16 = smov 0  }
   0xb   :  { %s1374_s17 = smov 0   ;;  %s1376_s18 = smov 0  }
   0xc LB: > { %s1594_s19 = sadd.s32 4294967295, %s1297_s18   ;;  %p62_p0 = scmp.ne.s32.totalorder %s1281_s14, %s1277_s13  ;;  %s1297_s18 = sphi %s1376_s18, %s28_s18   ;;  %s1293_s17 = sphi %s1374_s17, %s1612_s17   ;;  %s1289_s16 = sphi %s1372_s16, %s1611_s16   ;;  %s1285_s15 = sphi %s1370_s15, %s1610_s15   ;;  %s1281_s14 = sphi %s1368_s14, %s1609_s14   ;;  %s1277_s13 = sphi %s1366_s13, %s1608_s13  }
   0xd   : > { %p1398_p1 = scmp.eq.s32.totalorder %s1594_s19, 0  ;;  %p867_p2 = scmp.ge.s32.totalorder %s1297_s18, 1 }
   0xe   : > { %p293_p3 = scmp.lt.s32.totalorder %s1297_s18, 3  ;;  %s1299_s23 = smov [#allocation6]  }
   0xf   : > { %p1406_p4 = por %p1398_p1, %p62_p0  ;;  %s309_s24 = sshll.u32 %s1299_s23, 4  ;;  %s310_s24 = int_to_ptr.vmem [resolvable:$true] %s309_s24 }
  0x10   : > { %p1410_p5 = pnand %p867_p2, %p293_p3  ;;  %s1300_s25 = smov [#allocation8]  }
  0x11   : > { %s325_s26 = sshll.u32 %s1300_s25, 4  ;;  %s1301_s28 = smov [#allocation9]   ;;  %s1422_s26 = int_to_ptr.vmem [resolvable:$true] %s325_s26 }
  0x12   : > { %p992_p6 = pneg %p1410_p5  ;;  %s341_s29 = sshll.u32 %s1301_s28, 4  ;;  %s342_s29 = int_to_ptr.vmem [resolvable:$true] %s341_s29 }
  0x13   : > { %s1088_s30 = scalar_lea.vmem %s310_s24, 16  ;;  %s1095_s11 = scalar_lea.vmem %s310_s24, 32 }
  0x14   : > { %p1418_p7 = pnand %p992_p6, %p1398_p1  ;;  %p1089_p9 = scmp.ne.s32.totalorder %s310_s24, %s1088_s30 }
  0x15   : > { %p1096_p12 = scmp.lt.s32.totalorder %s310_s24, %s310_s24  ;;  %p1097_p13 = scmp.lt.s32.totalorder %s1095_s11, %s1088_s30 }
  0x16   : > { %p1079_p8 = pneg %p1418_p7 }
  0x17   : > { %p1098_p0 = por %p1097_p13, %p1096_p12 }
  0x18   : > { %p1091_p10 = pnand %p1089_p9, %p1079_p8 }
  0x1a   : > { %p1092_p11 = pneg %p1091_p10 }
  0x1c   : > { %p1099_p2 = pnand %p1098_p0, %p1092_p11 }
  0x1e   : > { %1102 = shalt.err (!%p1099_p2)
}
  0x1f   : > { %s1602_s2 = sld [smem:[#allocation19_spill]]  ;;  %s1114_s23 = scalar_lea.vmem %s1422_s26, 512 }
  0x20   : > { %p1115_p3 = scmp.ne.s32.totalorder %s1422_s26, %s1114_s23  ;;  %p1122_p10 = scmp.lt.s32.totalorder %s1422_s26, %s1422_s26 }
  0x21   : > { %p1123_p11 = scmp.lt.s32.totalorder %s1114_s23, %s1114_s23 }
  0x22   : > { %p1117_p6 = pnand %p1115_p3, %p1079_p8 }
  0x23   : > { %p1124_p12 = por %p1123_p11, %p1122_p10 }
  0x24   : > { %p1118_p9 = pneg %p1117_p6 }
  0x25   : > { %995 = dma.hbm_to_vmem [thread:$0]  (!%p1418_p7), %s1602_s2, 16, %s310_s24, [#allocation7]  }
  0x26   : > { %p1125_p13 = pnand %p1124_p12, %p1118_p9 }
  0x28   : > { %1128 = shalt.err (!%p1125_p13)
}
  0x29   : > { %s1302_s25 = smov 128   ;;  %s1303_s28 = smov 8  }
  0x2a   : > { %s1603_s5 = sld [smem:[#allocation20_spill]]  ;;  %s1140_s11 = scalar_lea.vmem %s342_s29, 2048 }
  0x2b   : > { %p1141_p0 = scmp.ne.s32.totalorder %s342_s29, %s1140_s11  ;;  %p1148_p6 = scmp.lt.s32.totalorder %s342_s29, %s342_s29 }
  0x2c   : > { %p1149_p9 = scmp.lt.s32.totalorder %s1140_s11, %s1140_s11 }
  0x2d   : > { %p1143_p2 = pnand %p1141_p0, %p1079_p8 }
  0x2e   : > { %p1150_p10 = por %p1149_p9, %p1148_p6 }
  0x2f   : > { %p1144_p3 = pneg %p1143_p2 }
  0x30   : > { %998 = dma.hbm_to_vmem [thread:$0]  (!%p1418_p7), %s1603_s5, 512, %s1422_s26, [#allocation7], %s1302_s25, %s1302_s25, %s1303_s28  }
  0x31   : > { %p1151_p11 = pnand %p1150_p10, %p1144_p3 }
  0x33   : > { %1154 = shalt.err (!%p1151_p11)
}
  0x34   : > { %s1604_s7 = sld [smem:[#allocation21_spill]]  ;;  %s37_s26 = sadd.s32 1, %s1293_s17 }
  0x35   : > { %p56_p8 = scmp.ne.s32.totalorder %s1285_s15, %s1281_s14  ;;  %p38_p12 = scmp.ge.s32.totalorder %s37_s26, 2 }
  0x36   : > { %p57_p13 = scmp.eq.s32.totalorder %s1297_s18, 0  ;;  %s49_s23 = sadd.s32 1, %s1285_s15 }
  0x37   : > { %s358_s27 = sand.u32 1, %s1285_s15   ;;  %s1614_s26 = smov (%p38_p12, %s37_s26), 0 }
  0x38   : > { %p58_p0 = por %p57_p13, %p56_p8  ;;  %p1009_p2 = scmp.lt.s32.totalorder %s1297_s18, 2 }
  0x39   : > { %s45_s30 = ssub.s32 %s1293_s17, %s1614_s26  ;;  %s872_s24 = sshll.u32 %s358_s27, 1 }
  0x3a   : > { %1001 = dma.hbm_to_vmem [thread:$0]  (!%p1418_p7), %s1604_s7, 2048, %s342_s29, [#allocation10], %s1302_s25, %s1302_s25, %s1303_s28  }
  0x3b   : > { %p47_p3 = scmp.eq.s32.totalorder %s45_s30, 0  ;;  %s873_s11 = sshll.u32 %s1293_s17, 5 }
  0x3c   : > { %s362_s12 = scalar_lea.vmem [#allocation3], %s872_s24  ;;  %s369_s28 = scalar_lea.hbm %s1583_s0, %s873_s11 }
  0x3d   : > { %s371_s13 = sshll.u32 %s362_s12, 4  ;;  %p1473_p7 = pnand %p1009_p2, %p58_p0  ;;  %s372_s13 = int_to_ptr.vmem [resolvable:$true] %s371_s13 }
  0x3e   : > { %s1468_s19 = scalar_select %p47_p3, %s1285_s15, %s49_s23  }
  0x3f   : > { %s359_s5 = scalar_lea.sflag [#allocation4], %s358_s27  ;;  %p1157_p6 = pneg %p1473_p7 }
  0x40   : > { %s1168_s7 = scalar_lea.vmem %s372_s13, 32  ;;  %s1304_s30 = smov [#allocation3]  }
  0x41   : > { %p1169_p9 = scmp.ne.s32.totalorder %s372_s13, %s1168_s7  ;;  %s1173_s23 = sshll.u32 %s1304_s30, 4  ;;  %s1174_s23 = int_to_ptr.vmem [resolvable:$false] %s1173_s23 }
  0x42   : > { %s1175_s24 = scalar_lea.vmem %s1174_s23, 64  ;;  %p1176_p8 = scmp.lt.s32.totalorder %s372_s13, %s1174_s23 }
  0x43   : > { %p1171_p10 = pnand %p1169_p9, %p1157_p6  ;;  %p1177_p12 = scmp.lt.s32.totalorder %s1175_s24, %s1168_s7 }
  0x45   : > { %p1172_p11 = pneg %p1171_p10  ;;  %p1178_p13 = por %p1177_p12, %p1176_p8 }
  0x47   : > { %p1179_p3 = pnand %p1178_p13, %p1172_p11 }
  0x49   : > { %1182 = shalt.err (!%p1179_p3)
}
  0x4a   : > { %1005 = dma.hbm_to_vmem [thread:$0]  (!%p1473_p7), %s369_s28, 32, %s372_s13, %s359_s5  }
  0x4b   : > { %380 = sbr.rel (%p1410_p5) target bundleno = 990 (0x3de), region = 56  ;;  %s382_s27 = sand.u32 (!%p1410_p5), 1, %s1281_s14  }
  0x4c   : > { %s875_s11 = sshll.u32 (!%p1410_p5), %s382_s27, 1  ;;  %s383_s12 = scalar_lea.sflag (!%p1410_p5), [#allocation4], %s382_s27 }
  0x4d   : > { %s386_s29 = scalar_lea.vmem (!%p1410_p5), [#allocation3], %s875_s11 }
  0x50   : > { %1256 = dma.done.wait (%p1406_p4), %s383_s12, 32  }
  0x51   : > { %1258 = vsyncadd (%p1406_p4), %s383_s12, 4294967264 }
  0x52   : > { %1260 = dma.done.wait (%p1398_p1), [#allocation7], 528  }
  0x53   : > { %1262 = vsyncadd (%p1398_p1), [#allocation7], 4294966768 }
  0x54   : > { %1264 = dma.done.wait (%p1398_p1), [#allocation10], 2048  }
  0x55   : > { %1266 = vsyncadd (%p1398_p1), [#allocation10], 4294965248  ;;  %p879_p5 = scmp.ne.s32.totalorder %s1289_s16, 0 }
  0x57   : > { %433 = sbr.rel (%p879_p5) target bundleno = 94 (0x5e), region = 76 }
  0x5c   : > { %vm434_vm0 = vcmask 1024   ;;  %v1305_v0 = vmov 0.0  }
  0x5d   : > { %435 = vst.msk [vmem:[#allocation2] sm:$0x3] %vm434_vm0, %v1305_v0 }
  0x5e PF: > { %v437_v1 = vld [vmem:[%s386_s29] sm:$0x3]  ;;  %vm438_vm1 = vcmask 1041408   ;;  %vm443_vm2 = vcmask 1024   ;;  %p880_p4 = scmp.ne.s32.totalorder %s1289_s16, 1 }
  0x5f   : > { %v439_v2 = vsel %vm438_vm1, %v437_v1, 0.0 }
  0x60   : > { %440 = vadd.xlane.f32.xlu0 %v439_v2 }
  0x64   : > { %v436_v3 = vld [vmem:[#allocation2] sm:$0x3] }
  0xe8   : > { %448 = sbr.rel (%p880_p4) target bundleno = 962 (0x3c2), region = 80 }
  0xe9   : > { %v441_v4 = vpop.xlane.xlu0 %440 }
  0xea   : > { %v442_v5 = vadd.f32 %v441_v4, %v436_v3 }
  0xec   : > { %444 = vst.msk [vmem:[#allocation2] sm:$0x3] %vm443_vm2, %v442_v5 }
  0xed   : > { %v1306_v7 = vmov 0   ;;  %v1307_v9 = vmov 0.0   ;;  %v472_v10 = vld [vmem:[%s1586_s3] sm:$0x7]  ;;  %vm484_vm3 = vcmask 1042432   ;;  %vm1308_vm4 = vmmov 0  }
  0xee   : > { %1076 = vset.pattern.permute.xlu0 %v1306_v7  ;;  %919 = vmatprep.subr.mxu1 %v1307_v9  ;;  %v881_v11 = vld [vmem:[%s1584_s1] ss:$0 sm:$0xff]  ;;  %v882_v12 = vld [vmem:[#allocation6] ss:$0 sm:$0xff]  ;;  %vm480_vm5 = vcmask 23552   ;;  %v561_v17 = vld [vmem:[#allocation8 + $0x10] sm:$0xff] }
  0xef   : > { %920 = vmatpush3.msk.msra.mxu1 %vm484_vm3, %v472_v10  ;;  %935 = vmatprep.subr.mxu0 %v1307_v9  ;;  %v562_v16 = vld [vmem:[#allocation8 + $0x18] sm:$0xff]  ;;  %v560_v18 = vld [vmem:[#allocation8 + $0x8] sm:$0xff]  ;;  %v559_v19 = vld [vmem:[#allocation8] sm:$0xff]  ;;  %vm570_vm6 = vcmask 261120  }
  0xf0   : > { %921 = vmatprep.mubr.msk.f32.mxu1 %vm1308_vm4, %v1307_v9  ;;  %924 = vmatprep.subr.mxu1 %v1307_v9  ;;  %v659_v20 = vld [vmem:[#allocation9 + $0x78] sm:$0xff]  ;;  %v658_v21 = vld [vmem:[#allocation9 + $0x70] sm:$0xff]  ;;  %v657_v22 = vld [vmem:[#allocation9 + $0x68] sm:$0xff] }
  0xf1   : > { %967 = vmatprep.mubr.msk.f32.mxu0 %vm1308_vm4, %v1307_v9  ;;  %936 = vmatpush3.msra.mxu0 %v659_v20  ;;  %v656_v23 = vld [vmem:[#allocation9 + $0x60] sm:$0xff]  ;;  %v655_v24 = vld [vmem:[#allocation9 + $0x58] sm:$0xff]  ;;  %v654_v25 = vld [vmem:[#allocation9 + $0x50] sm:$0xff] }
  0xf2   : > { %937 = vmatprep.subr.mxu0 %v1307_v9  ;;  %v653_v26 = vld [vmem:[#allocation9 + $0x48] sm:$0xff]  ;;  %v652_v27 = vld [vmem:[#allocation9 + $0x40] sm:$0xff]  ;;  %v651_v28 = vld [vmem:[#allocation9 + $0x38] sm:$0xff] }
  0xf3   : > { %v449_v6 = vld [vmem:[#allocation2] sm:$0x3]  ;;  %938 = vmatpush3.msra.mxu0 %v658_v21  ;;  %v650_v29 = vld [vmem:[#allocation9 + $0x30] sm:$0xff]  ;;  %v649_v30 = vld [vmem:[#allocation9 + $0x28] sm:$0xff] }
  0xf4   : > { %v450_v8 = vmul.f32 0.00390625, %v449_v6  ;;  %939 = vmatprep.subr.mxu0 %v1307_v9  ;;  %v648_v31 = vld [vmem:[#allocation9 + $0x20] sm:$0xff]  ;;  %v647_v32 = vld [vmem:[#allocation9 + $0x18] sm:$0xff]  ;;  %v646_v33 = vld [vmem:[#allocation9 + $0x10] sm:$0xff] }
  0xf5   : > { %940 = vmatpush3.msra.mxu0 %v657_v22  ;;  %v883_v34 = vld [vmem:[%s1587_s4] ss:$0 sm:$0xff]  ;;  %v645_v39 = vld [vmem:[#allocation9 + $0x8] sm:$0xff]  ;;  %v644_v40 = vld [vmem:[#allocation9] sm:$0xff] }
  0xf6   : > { %454 = vperm.xlu0 %1076, %v450_v8   ;;  %941 = vmatprep.subr.mxu0 %v1307_v9  ;;  %v886_v41 = vld [vmem:[%s1589_s6] ss:$0 sm:$0xff] }
  0xf7   : > { %942 = vmatpush3.msra.mxu0 %v656_v23  ;;  %v888_v45 = vld [vmem:[%s1591_s8] ss:$0 sm:$0xff] }
  0xf8   : > { %943 = vmatprep.subr.mxu0 %v1307_v9 }
  0xf9   : > { %944 = vmatpush3.msra.mxu0 %v655_v24 }
  0xfa   : > { %945 = vmatprep.subr.mxu0 %v1307_v9 }
  0xfb   : > { %946 = vmatpush3.msra.mxu0 %v654_v25 }
  0xfc   : > { %947 = vmatprep.subr.mxu0 %v1307_v9 }
  0xfd   : > { %948 = vmatpush3.msra.mxu0 %v653_v26 }
  0xfe   : > { %949 = vmatprep.subr.mxu0 %v1307_v9 }
  0xff   : > { %950 = vmatpush3.msra.mxu0 %v652_v27 }
 0x100   : > { %951 = vmatprep.subr.mxu0 %v1307_v9 }
 0x101   : > { %952 = vmatpush3.msra.mxu0 %v651_v28 }
 0x102   : > { %953 = vmatprep.subr.mxu0 %v1307_v9 }
 0x103   : > { %954 = vmatpush3.msra.mxu0 %v650_v29 }
 0x104   : > { %955 = vmatprep.subr.mxu0 %v1307_v9 }
 0x105   : > { %956 = vmatpush3.msra.mxu0 %v649_v30 }
 0x106   : > { %957 = vmatprep.subr.mxu0 %v1307_v9 }
 0x107   : > { %958 = vmatpush3.msra.mxu0 %v648_v31 }
 0x108   : > { %959 = vmatprep.subr.mxu0 %v1307_v9 }
 0x109   : > { %960 = vmatpush3.msra.mxu0 %v647_v32 }
 0x10a   : > { %961 = vmatprep.subr.mxu0 %v1307_v9 }
 0x10b   : > { %962 = vmatpush3.msra.mxu0 %v646_v33 }
 0x10c   : > { %963 = vmatprep.subr.mxu0 %v1307_v9 }
 0x10d   : > { %964 = vmatpush3.msra.mxu0 %v645_v39 }
 0x10e   : > { %965 = vmatprep.subr.mxu0 %v1307_v9 }
 0x10f   : > { %966 = vmatpush3.msra.mxu0 %v644_v40 }
 0x171   : > { %v455_v13 = vpop.permute.xlu0 %454 }
 0x172   : > { %v463_v14 = vmul.f32 %v881_v11, %v455_v13 }
 0x174   : > { %v471_v15 = vadd.f32 %v882_v12, %v463_v14 }
 0x176   : > { %922 = vmatmul.mubr.msk.f32.vlgmr.msra.gmra.mxu1 %vm480_vm5, %v471_v15 }
 0x177   : > { %925 = vmatpush3.msra.mxu1 %v562_v16  ;;  %932 = vmatprep.mubr.msk.f32.mxu1 %vm1308_vm4, %v1307_v9 }
 0x178   : > { %926 = vmatprep.subr.mxu1 %v1307_v9 }
 0x179   : > { %927 = vmatpush3.msra.mxu1 %v561_v17 }
 0x17a   : > { %928 = vmatprep.subr.mxu1 %v1307_v9 }
 0x17b   : > { %929 = vmatpush3.msra.mxu1 %v560_v18 }
 0x17c   : > { %930 = vmatprep.subr.mxu1 %v1307_v9 }
 0x17d   : > { %931 = vmatpush3.msra.mxu1 %v559_v19 }
 0x236   : > { %v554_v35 = vpop.f32.mrf.mxu1 }
 0x237   : > { %v555_v36 = vadd.f32 %v883_v34, %v554_v35 }
 0x238   : > { %v923_v37 = vpop.f32.mrf.mxu1 }
 0x239   : > { %v558_v38 = vmax.f32 %v555_v36, 0.0 }
 0x23b   : > { %933 = vmatmul.mubr.msk.f32.vlgmr.msra.gmra.mxu1 %vm570_vm6, %v558_v38 }
 0x2fb   : > { %v640_v42 = vpop.f32.mrf.mxu1 }
 0x2fc   : > { %v641_v43 = vadd.f32 %v886_v41, %v640_v42 }
 0x2fd   : > { %v934_v44 = vpop.f32.mrf.mxu1 }
 0x2fe   : > { %738 = vst [vmem:[#allocation12] sm:$0x3] %v641_v43  ;;  %968 = vmatmul.mubr.f32.vlgmr.msra.gmra.mxu0 %v641_v43 }
 0x3be   : > { %v733_v46 = vpop.f32.mrf.mxu0 }
 0x3bf   : > { %v734_v47 = vadd.f32 %v888_v45, %v733_v46 }
 0x3c0   : > { %v969_v48 = vpop.f32.mrf.mxu0 }
 0x3c1   : > { %737 = vst [vmem:[#allocation11] sm:$0x3] %v734_v47 }
 0x3c2 PF: > { %s1606_s30 = sadd.s32 4294967295, %s1297_s18   ;;  %s1309_s24 = smov [#allocation11]  }
 0x3c3   : > { %p1539_p1 = scmp.eq.s32.totalorder %s1606_s30, 1  ;;  %s748_s27 = sshll.u32 %s1309_s24, 4  ;;  %s749_s27 = int_to_ptr.vmem [resolvable:$true] %s748_s27 }
 0x3c4   : > { %s1310_s11 = smov [#allocation12]   ;;  %s1183_s29 = scalar_lea.vmem %s749_s27, 32 }
 0x3c5   : > { %s761_s12 = sshll.u32 %s1310_s11, 4  ;;  %p1184_p0 = scmp.ne.s32.totalorder %s749_s27, %s1183_s29  ;;  %s762_s12 = int_to_ptr.vmem [resolvable:$true] %s761_s12 }
 0x3c6   : > { %p1190_p6 = scmp.lt.s32.totalorder %s749_s27, %s749_s27  ;;  %p1191_p9 = scmp.lt.s32.totalorder %s1183_s29, %s1183_s29 }
 0x3c7   : > { %p1185_p2 = pnand %p1184_p0, %p1539_p1 }
 0x3c8   : > { %p1192_p10 = por %p1191_p9, %p1190_p6 }
 0x3c9   : > { %p1186_p7 = pneg %p1185_p2 }
 0x3cb   : > { %p1193_p11 = pnand %p1192_p10, %p1186_p7 }
 0x3cd   : > { %1196 = shalt.err (!%p1193_p11)
}
 0x3ce   : > { %985 = dma.vmem_to_hbm [thread:$0]  (%p1539_p1), %s749_s27, 32, %s1592_s9, [#allocation5]  }
 0x3cf   : > { %s1207_s7 = scalar_lea.vmem %s762_s12, 32  ;;  %p1214_p3 = scmp.lt.s32.totalorder %s762_s12, %s762_s12 }
 0x3d0   : > { %p1208_p8 = scmp.ne.s32.totalorder %s762_s12, %s1207_s7  ;;  %p1215_p5 = scmp.lt.s32.totalorder %s1207_s7, %s1207_s7 }
 0x3d2   : > { %p1209_p12 = pnand %p1208_p8, %p1539_p1  ;;  %p1216_p4 = por %p1215_p5, %p1214_p3 }
 0x3d4   : > { %p1210_p13 = pneg %p1209_p12 }
 0x3d6   : > { %p1217_p0 = pnand %p1216_p4, %p1210_p13 }
 0x3d8   : > { %1220 = shalt.err (!%p1217_p0)
}
 0x3d9   : > { %987 = dma.vmem_to_hbm [thread:$0]  (%p1539_p1), %s762_s12, 32, %s1593_s10, [#allocation13]  }
 0x3da   : > { %1268 = dma.done.wait (%p1539_p1), [#allocation5], 32  }
 0x3db   : > { %1270 = vsyncadd (%p1539_p1), [#allocation5], 4294967264 }
 0x3dc   : > { %1272 = dma.done.wait (%p1539_p1), [#allocation13], 32  }
 0x3dd   : > { %1274 = vsyncadd (%p1539_p1), [#allocation13], 4294967264 }
 0x3de PF: > { %s28_s18 = sadd.s32 1, %s1297_s18   ;;  %s1608_s13 = smov %s1281_s14 }
 0x3df   : > { %p25_p2 = scmp.ge.s32.totalorder %s28_s18, 4   ;;  %s1609_s14 = smov %s1285_s15 }
 0x3e0   : > { %s1610_s15 = smov %s1468_s19  ;;  %s1611_s16 = smov %s1293_s17 }
 0x3e1   : > { %s1612_s17 = smov %s1614_s26  ;;  %27 = sbr.rel (!%p25_p2) target bundleno = 12 (0xc), region = 123 }
 0x3e6   :  { %778 = vsyncpa [#allocation4], 1 }
 0x3e7   :  { %780 = vsyncpa [#allocation4 + $0x1], 1 }
 0x3e8   :  { %781 = vsyncpa [#allocation7], 1 }
 0x3e9   :  { %782 = vsyncpa [#allocation10], 1 }
 0x3ea   :  { %783 = vsyncpa [#allocation5], 1 }
 0x3eb   :  { %785 = vsyncpa [#allocation5 + $0x1], 1 }
 0x3ec   :  { %786 = vsyncpa [#allocation13], 1 }

</bundles_post_ra>
